<compile_context>
chip_gen: v7x
topology: tpu7x:2x2x1
jax: 0.10.0
libtpu: 0.0.40
codegen_flags: <defaults>
</compile_context>

<pallas_src>
import functools

import jax
import jax.numpy as jnp
from jax.experimental import pallas as pl
from jax.experimental.pallas import tpu as pltpu


def _round_up(x, m):
    return (x + m - 1) // m * m


def _vmem_limit_bytes():
    """Scoped-VMEM request: ~3/4 of physical VMEM, capped (v7x has 64 MiB/TC)."""
    cap = None
    try:
        info = pltpu.get_tpu_info()
        for attr in ("vmem_capacity_bytes", "vmem_bytes", "vmem_size_bytes"):
            v = getattr(info, attr, None)
            if v:
                cap = int(v)
                break
    except Exception:
        cap = None
    if cap is None:
        return 64 * 1024 * 1024                      # safe default (fits all gens)
    return min((cap * 3) // 4, 96 * 1024 * 1024)     # ~48 MiB on v7x, 96 MiB on v5e/v6e


# ---------------------------------------------------------------------------
# Pallas kernels
# ---------------------------------------------------------------------------

def _matmul_stats_kernel(p_ref, w_ref, y_ref, sum_ref, sq_ref):
    """Phase 1: y_tile = P_tile @ W (bf16 MXU, f32 acc) + streaming channel stats.

    Grid = (n_split, tiles_per_split): outer axis "parallel" (megacore), inner
    "arbitrary". Stats are per-split partials (block index = split id).
    """
    @pl.when(pl.program_id(1) == 0)
    def _():
        sum_ref[...] = jnp.zeros_like(sum_ref)
        sq_ref[...] = jnp.zeros_like(sq_ref)

    y = jnp.dot(p_ref[...], w_ref[...], preferred_element_type=jnp.float32)
    y_ref[...] = y.astype(y_ref.dtype)                       # bf16 intermediate
    # Stats from the full-precision f32 accumulation (before the bf16 cast).
    sum_ref[...] += jnp.sum(y, axis=0, keepdims=True)[None]
    sq_ref[...] += jnp.sum(y * y, axis=0, keepdims=True)[None]


def _affine_lrelu_kernel(y_ref, scale_ref, shift_ref, o_ref, *, neg_slope):
    """Phase 2: folded BatchNorm (per-channel FMA) + LeakyReLU."""
    y = y_ref[...].astype(jnp.float32) * scale_ref[...] + shift_ref[...]
    o_ref[...] = jnp.maximum(y, neg_slope * y).astype(o_ref.dtype)


def _matmul_lrelu_kernel(p_ref, w_ref, o_ref, *, neg_slope):
    """use_bn=False path: matmul + LeakyReLU fused in a single pass."""
    y = jnp.dot(p_ref[...], w_ref[...], preferred_element_type=jnp.float32)
    o_ref[...] = jnp.maximum(y, neg_slope * y).astype(o_ref.dtype)


# ---------------------------------------------------------------------------
# JAX glue
# ---------------------------------------------------------------------------

def _im2col(x, kernel_size, stride, padding, *, data_format, compute_dtype):
    """Input -> [N*OH*OW, KH*KW*C] patch matrix in (kh, kw, c)-minor order.

    Casts to the matmul dtype (bf16) *before* building the big patch tensor so
    the 4x-larger intermediate is only ever written in bf16.
    """
    if data_format == "NCHW":
        x = jnp.transpose(x, (0, 2, 3, 1))
    x = x.astype(compute_dtype)
    n, h, w, c = x.shape
    kh = kw = kernel_size
    xpad = jnp.pad(x, ((0, 0), (padding, padding), (padding, padding), (0, 0)))
    oh = (h + 2 * padding - kh) // stride + 1
    ow = (w + 2 * padding - kw) // stride + 1
    slices = []
    for i in range(kh):
        for j in range(kw):
            slices.append(xpad[:, i:i + oh * stride:stride, j:j + ow * stride:stride, :])
    patches = jnp.stack(slices, axis=3)                      # [N, OH, OW, KH*KW, C]
    return patches.reshape(n * oh * ow, kh * kw * c), (n, oh, ow)


def dcgan_block_forward(x, weight, gamma, beta, *, kernel_size, stride, padding,
                        use_bn=True, neg_slope=0.2, eps=1e-5,
                        tile_m=512, tile_m_phase2=2048,
                        matmul_dtype=jnp.bfloat16,
                        intermediate_dtype=jnp.bfloat16,
                        out_dtype=jnp.float32,
                        data_format="NCHW"):
    """x: [N,C,H,W] (NCHW) or [N,H,W,C] (NHWC); weight: [OC,C,KH,KW]; gamma/beta: [OC].

    For chained Blocks prefer data_format="NHWC" and out_dtype=jnp.bfloat16.
    """
    oc = weight.shape[0]
    patches, (n, oh, ow) = _im2col(x, kernel_size, stride, padding,
                                   data_format=data_format, compute_dtype=matmul_dtype)
    m, k = patches.shape

    # Lane padding only when cheap: OC < 128 keeps the true width (masked
    # stores beat 2-16x extra HBM traffic); OC >= 128 rounds up to 128.
    ocp = oc if oc < 128 else _round_up(oc, 128)

    # Permute the tiny weight to the patch ordering (kh, kw, c); pad columns.
    w_mat = jnp.transpose(weight, (2, 3, 1, 0)).reshape(k, oc)
    if ocp != oc:
        w_mat = jnp.pad(w_mat, ((0, 0), (0, ocp - oc)))
    w_mat = w_mat.astype(matmul_dtype)

    vmem_limit = _vmem_limit_bytes()
    vmem_budget = int(vmem_limit * 0.85)

    y_itemsize = jnp.dtype(intermediate_dtype if use_bn else out_dtype).itemsize

    # --- Phase-1 / matmul tile over M: biggest (multiple of 16) that fits VMEM.
    def p1_bytes(t):
        return (2 * t * k * 2                 # P bf16, double-buffered
                + 2 * k * ocp * 2             # W bf16, double-buffered
                + 2 * t * ocp * y_itemsize    # Y tile, double-buffered
                + 8 * ocp * 4)                # stats
    tm = max(16, min(_round_up(tile_m, 16), _round_up(m, 16)))
    while tm > 16 and p1_bytes(tm) > vmem_budget:
        tm = max(16, _round_up(tm // 2, 16))

    # Split the M tiles across a leading "parallel" axis so v7x uses both TCs.
    n_split = 2 if _round_up(m, tm) // tm >= 2 else 1
    m_pad = _round_up(m, n_split * tm)
    tiles_per_split = m_pad // (n_split * tm)
    n_tiles = m_pad // tm
    if m_pad != m:
        patches = jnp.pad(patches, ((0, m_pad - m), (0, 0)))  # zero rows: no BN impact

    cp_matmul = pltpu.CompilerParams(dimension_semantics=("parallel", "arbitrary"),
                                     vmem_limit_bytes=vmem_limit)
    cp_par1d = pltpu.CompilerParams(dimension_semantics=("parallel",),
                                    vmem_limit_bytes=vmem_limit)

    if not use_bn:
        y = pl.pallas_call(
            functools.partial(_matmul_lrelu_kernel, neg_slope=neg_slope),
            out_shape=jax.ShapeDtypeStruct((m_pad, ocp), out_dtype),
            grid=(n_tiles,),
            in_specs=[pl.BlockSpec((tm, k), lambda i: (i, 0)),
                      pl.BlockSpec((k, ocp), lambda i: (0, 0))],
            out_specs=pl.BlockSpec((tm, ocp), lambda i: (i, 0)),
            compiler_params=cp_par1d,
        )(patches, w_mat)
    else:
        p_spec = pl.BlockSpec((tm, k), lambda c, i: (c * tiles_per_split + i, 0))
        w_spec = pl.BlockSpec((k, ocp), lambda c, i: (0, 0))      # resident weight
        y_spec = pl.BlockSpec((tm, ocp), lambda c, i: (c * tiles_per_split + i, 0))
        stat_spec = pl.BlockSpec((1, 1, ocp), lambda c, i: (c, 0, 0))

        # Phase 1: matmul + per-split per-channel sum / sum-of-squares.
        y_lin, psum, psq = pl.pallas_call(
            _matmul_stats_kernel,
            out_shape=(jax.ShapeDtypeStruct((m_pad, ocp), intermediate_dtype),
                       jax.ShapeDtypeStruct((n_split, 1, ocp), jnp.float32),
                       jax.ShapeDtypeStruct((n_split, 1, ocp), jnp.float32)),
            grid=(n_split, tiles_per_split),
            in_specs=[p_spec, w_spec],
            out_specs=(y_spec, stat_spec, stat_spec),
            compiler_params=cp_matmul,
        )(patches, w_mat)

        # Fold training-mode BatchNorm (biased variance over N*OH*OW) into a
        # per-channel scale/shift once; tiny [1, OCp] math outside the hot loop.
        ch_sum = jnp.sum(psum, axis=0).reshape(1, ocp)
        ch_sq = jnp.sum(psq, axis=0).reshape(1, ocp)
        m_f = jnp.float32(m)
        mean = ch_sum / m_f
        var = jnp.maximum(ch_sq / m_f - mean * mean, 0.0)
        g = gamma.astype(jnp.float32)
        b = beta.astype(jnp.float32)
        if ocp != oc:
            g = jnp.pad(g, (0, ocp - oc))
            b = jnp.pad(b, (0, ocp - oc))
        scale = g.reshape(1, ocp) * jax.lax.rsqrt(var + eps)
        shift = b.reshape(1, ocp) - mean * scale

        # Phase 2: pure load/FMA/store -> decouple the tile size and make it as
        # large as VMEM allows (amortizes per-grid-step overhead).
        out_itemsize = jnp.dtype(out_dtype).itemsize
        in_itemsize = jnp.dtype(intermediate_dtype).itemsize

        def p2_bytes(t):
            return 2 * t * ocp * (in_itemsize + out_itemsize) + 8 * ocp * 4

        tm2 = tm
        tm2_cap = max(tile_m_phase2, tm)
        for f in range(n_tiles, 0, -1):
            cand = tm * f
            if n_tiles % f == 0 and cand <= tm2_cap and p2_bytes(cand) <= vmem_budget:
                tm2 = cand
                break
        grid2 = (m_pad // tm2,)

        # Alias the output onto y_lin when dtypes match (bf16 chained output):
        # halves the peak HBM footprint of the intermediate.
        alias = {0: 0} if jnp.dtype(out_dtype) == jnp.dtype(intermediate_dtype) else {}

        y = pl.pallas_call(
            functools.partial(_affine_lrelu_kernel, neg_slope=neg_slope),
            out_shape=jax.ShapeDtypeStruct((m_pad, ocp), out_dtype),
            grid=grid2,
            in_specs=[pl.BlockSpec((tm2, ocp), lambda i: (i, 0)),
                      pl.BlockSpec((1, ocp), lambda i: (0, 0)),
                      pl.BlockSpec((1, ocp), lambda i: (0, 0))],
            out_specs=pl.BlockSpec((tm2, ocp), lambda i: (i, 0)),
            input_output_aliases=alias,
            compiler_params=cp_par1d,
        )(y_lin, scale, shift)

    y = y[:m, :oc].reshape(n, oh, ow, oc)
    if data_format == "NCHW":
        y = jnp.transpose(y, (0, 3, 1, 2))
    return y


# ---------------------------------------------------------------------------
# Reference + smoke test
# ---------------------------------------------------------------------------

def _reference(x, weight, gamma, beta, *, stride, padding, use_bn, neg_slope, eps):
    y = jax.lax.conv_general_dilated(
        x, weight, window_strides=(stride, stride),
        padding=((padding, padding), (padding, padding)),
        dimension_numbers=('NCHW', 'OIHW', 'NCHW'))
    if use_bn:
        mean = y.mean(axis=(0, 2, 3), keepdims=True)
        var = ((y - mean) ** 2).mean(axis=(0, 2, 3), keepdims=True)
        y = (y - mean) / jnp.sqrt(var + eps)
        y = y * gamma[None, :, None, None] + beta[None, :, None, None]
    return jnp.where(y >= 0, y, neg_slope * y)


if __name__ == "__main__":
    # Block(in_channels=4, out_channels=8, kernel_size=4, stride=2, padding=1)
    N, C, H, W = 2, 4, 16, 16
    OC, KS, STRIDE, PAD = 8, 4, 2, 1

    key = jax.random.PRNGKey(0)
    kx, kw, kg, kb = jax.random.split(key, 4)
    x = jax.random.normal(kx, (N, C, H, W), dtype=jnp.float32)
    weight = 0.02 * jax.random.normal(kw, (OC, C, KS, KS), dtype=jnp.float32)
    gamma = 1.0 + 0.1 * jax.random.normal(kg, (OC,), dtype=jnp.float32)
    beta = 0.1 * jax.random.normal(kb, (OC,), dtype=jnp.float32)

    # The kernel feeds the MXU bf16 operands (with f32 accumulation); compare
    # against a reference built from identically-rounded operands so the check
    # isolates kernel correctness from operand-dtype rounding. The BN paths use
    # a bf16 intermediate, hence the slightly looser tolerances there.
    x_r = x.astype(jnp.bfloat16).astype(jnp.float32)
    w_r = weight.astype(jnp.bfloat16).astype(jnp.float32)

    configs = [
        dict(use_bn=True,  data_format="NCHW", out_dtype=jnp.float32,  rtol=8e-3,   atol=5e-3),
        dict(use_bn=False, data_format="NCHW", out_dtype=jnp.float32,  rtol=2e-3,   atol=2e-3),
        # Chained-block configuration: NHWC in/out, bf16 output, aliased y_lin.
        dict(use_bn=True,  data_format="NHWC", out_dtype=jnp.bfloat16, rtol=1.5e-2, atol=1e-2),
    ]

    for cfg in configs:
        fwd = jax.jit(functools.partial(
            dcgan_block_forward, kernel_size=KS, stride=STRIDE, padding=PAD,
            use_bn=cfg["use_bn"], out_dtype=cfg["out_dtype"],
            data_format=cfg["data_format"]))
        xin = x if cfg["data_format"] == "NCHW" else jnp.transpose(x, (0, 2, 3, 1))
        out = jax.block_until_ready(fwd(xin, weight, gamma, beta))

        ref = _reference(x_r, w_r, gamma, beta, stride=STRIDE, padding=PAD,
                         use_bn=cfg["use_bn"], neg_slope=0.2, eps=1e-5)
        if cfg["data_format"] == "NHWC":
            ref = jnp.transpose(ref, (0, 2, 3, 1))

        assert out.shape == ref.shape, (out.shape, ref.shape)
        out_f32 = out.astype(jnp.float32)
        err = float(jnp.max(jnp.abs(out_f32 - ref)))
        assert jnp.allclose(out_f32, ref, rtol=cfg["rtol"], atol=cfg["atol"]), (cfg, err)

    print("KERNEL_OK")
</pallas_src>

<mosaic_0001>
module attributes {stable_mosaic.version = 11 : i64} {
  func.func @_matmul_stats_kernel(%arg0: i32, %arg1: i32, %arg2: memref<128x64xbf16, #tpu.memory_space<vmem>>, %arg3: memref<64x8xbf16, #tpu.memory_space<vmem>>, %arg4: memref<128x8xbf16, #tpu.memory_space<vmem>>, %arg5: memref<1x1x8xf32, #tpu.memory_space<vmem>>, %arg6: memref<1x1x8xf32, #tpu.memory_space<vmem>>) attributes {dimension_semantics = [#tpu.dimension_semantics<parallel>, #tpu.dimension_semantics<arbitrary>], iteration_bounds = array<i64: 1, 1>, scalar_prefetch = 0 : i64, scratch_operands = 0 : i64, tpu.core_type = #tpu.core_type<tc>, window_params = [{transform_indices = @transform_0, window_bounds = array<i64: 128, 64>}, {pipeline_mode = #tpu.pipeline_mode<synchronous>, transform_indices = @transform_1, window_bounds = array<i64: 64, 8>}, {transform_indices = @transform_2, window_bounds = array<i64: 128, 8>}, {transform_indices = @transform_3, window_bounds = array<i64: 1, 1, 8>}, {transform_indices = @transform_4, window_bounds = array<i64: 1, 1, 8>}]} {
    %c0_i32 = arith.constant 0 : i32
    %0 = arith.cmpi eq, %arg1, %c0_i32 : i32
    %1 = arith.extui %0 : i1 to i32
    %c0_i32_0 = arith.constant 0 : i32
    %2 = arith.cmpi ne, %1, %c0_i32_0 : i32
    scf.if %2 {
      %cst_20 = arith.constant 0.000000e+00 : f32
      %21 = vector.broadcast %cst_20 : f32 to vector<1x1x8xf32>
      %c0_21 = arith.constant 0 : index
      %c0_22 = arith.constant 0 : index
      %c0_23 = arith.constant 0 : index
      %22 = vector.load %arg5[%c0_21, %c0_22, %c0_23] : memref<1x1x8xf32, #tpu.memory_space<vmem>>, vector<1x1x8xf32>
      tpu.vector_store %arg5[%c0_21, %c0_22, %c0_23], %21 {strides = array<i32>} : memref<1x1x8xf32, #tpu.memory_space<vmem>>, vector<1x1x8xf32>,
      %cst_24 = arith.constant 0.000000e+00 : f32
      %23 = vector.broadcast %cst_24 : f32 to vector<1x1x8xf32>
      %c0_25 = arith.constant 0 : index
      %c0_26 = arith.constant 0 : index
      %c0_27 = arith.constant 0 : index
      %24 = vector.load %arg6[%c0_25, %c0_26, %c0_27] : memref<1x1x8xf32, #tpu.memory_space<vmem>>, vector<1x1x8xf32>
      tpu.vector_store %arg6[%c0_25, %c0_26, %c0_27], %23 {strides = array<i32>} : memref<1x1x8xf32, #tpu.memory_space<vmem>>, vector<1x1x8xf32>,
    } else {
    }
    %c0 = arith.constant 0 : index
    %c0_1 = arith.constant 0 : index
    %3 = vector.load %arg2[%c0, %c0_1] : memref<128x64xbf16, #tpu.memory_space<vmem>>, vector<128x64xbf16>
    %c0_2 = arith.constant 0 : index
    %c0_3 = arith.constant 0 : index
    %4 = vector.load %arg3[%c0_2, %c0_3] : memref<64x8xbf16, #tpu.memory_space<vmem>>, vector<64x8xbf16>
    %cst = arith.constant dense<0.000000e+00> : vector<128x8xf32>
    %5 = tpu.matmul %3, %4, %cst {dimension_numbers = #tpu.dot_dimension_numbers<[1], [0], [0], [1], [0, 0, 1, 1], [], []>} : vector<128x64xbf16>, vector<64x8xbf16>, vector<128x8xf32> -> vector<128x8xf32>
    %6 = arith.truncf %5 : vector<128x8xf32> to vector<128x8xbf16>
    %c0_4 = arith.constant 0 : index
    %c0_5 = arith.constant 0 : index
    %7 = vector.load %arg4[%c0_4, %c0_5] : memref<128x8xbf16, #tpu.memory_space<vmem>>, vector<128x8xbf16>
    tpu.vector_store %arg4[%c0_4, %c0_5], %6 {strides = array<i32>} : memref<128x8xbf16, #tpu.memory_space<vmem>>, vector<128x8xbf16>,
    %c0_6 = arith.constant 0 : index
    %c0_7 = arith.constant 0 : index
    %c0_8 = arith.constant 0 : index
    %8 = vector.load %arg5[%c0_6, %c0_7, %c0_8] : memref<1x1x8xf32, #tpu.memory_space<vmem>>, vector<1x1x8xf32>
    %cst_9 = arith.constant dense<0.000000e+00> : vector<8xf32>
    %9 = vector.multi_reduction <add>, %5, %cst_9 [0] : vector<128x8xf32> to vector<8xf32>
    %10 = vector.shape_cast %9 : vector<8xf32> to vector<1x8xf32>
    %11 = vector.shape_cast %10 : vector<1x8xf32> to vector<1x1x8xf32>
    %12 = arith.addf %8, %11 : vector<1x1x8xf32>
    %c0_10 = arith.constant 0 : index
    %c0_11 = arith.constant 0 : index
    %c0_12 = arith.constant 0 : index
    %13 = vector.load %arg5[%c0_10, %c0_11, %c0_12] : memref<1x1x8xf32, #tpu.memory_space<vmem>>, vector<1x1x8xf32>
    tpu.vector_store %arg5[%c0_10, %c0_11, %c0_12], %12 {strides = array<i32>} : memref<1x1x8xf32, #tpu.memory_space<vmem>>, vector<1x1x8xf32>,
    %c0_13 = arith.constant 0 : index
    %c0_14 = arith.constant 0 : index
    %c0_15 = arith.constant 0 : index
    %14 = vector.load %arg6[%c0_13, %c0_14, %c0_15] : memref<1x1x8xf32, #tpu.memory_space<vmem>>, vector<1x1x8xf32>
    %15 = arith.mulf %5, %5 : vector<128x8xf32>
    %cst_16 = arith.constant dense<0.000000e+00> : vector<8xf32>
    %16 = vector.multi_reduction <add>, %15, %cst_16 [0] : vector<128x8xf32> to vector<8xf32>
    %17 = vector.shape_cast %16 : vector<8xf32> to vector<1x8xf32>
    %18 = vector.shape_cast %17 : vector<1x8xf32> to vector<1x1x8xf32>
    %19 = arith.addf %14, %18 : vector<1x1x8xf32>
    %c0_17 = arith.constant 0 : index
    %c0_18 = arith.constant 0 : index
    %c0_19 = arith.constant 0 : index
    %20 = vector.load %arg6[%c0_17, %c0_18, %c0_19] : memref<1x1x8xf32, #tpu.memory_space<vmem>>, vector<1x1x8xf32>
    tpu.vector_store %arg6[%c0_17, %c0_18, %c0_19], %19 {strides = array<i32>} : memref<1x1x8xf32, #tpu.memory_space<vmem>>, vector<1x1x8xf32>,
    return
  }
  func.func @transform_0(%arg0: i32, %arg1: i32) -> (i32, i32) {
    %c1_i32 = arith.constant 1 : i32
    %0 = arith.muli %arg0, %c1_i32 : i32
    %1 = arith.addi %0, %arg1 : i32
    %c0_i32 = arith.constant 0 : i32
    %c0_i32_0 = arith.constant 0 : i32
    return %1, %c0_i32 : i32, i32
  }
  func.func @transform_1(%arg0: i32, %arg1: i32) -> (i32, i32) {
    %c0_i32 = arith.constant 0 : i32
    %c0_i32_0 = arith.constant 0 : i32
    %c0_i32_1 = arith.constant 0 : i32
    return %c0_i32, %c0_i32_0 : i32, i32
  }
  func.func @transform_2(%arg0: i32, %arg1: i32) -> (i32, i32) {
    %c1_i32 = arith.constant 1 : i32
    %0 = arith.muli %arg0, %c1_i32 : i32
    %1 = arith.addi %0, %arg1 : i32
    %c0_i32 = arith.constant 0 : i32
    %c0_i32_0 = arith.constant 0 : i32
    return %1, %c0_i32 : i32, i32
  }
  func.func @transform_3(%arg0: i32, %arg1: i32) -> (i32, i32, i32) {
    %c0_i32 = arith.constant 0 : i32
    %c0_i32_0 = arith.constant 0 : i32
    %c0_i32_1 = arith.constant 0 : i32
    return %arg0, %c0_i32, %c0_i32_0 : i32, i32, i32
  }
  func.func @transform_4(%arg0: i32, %arg1: i32) -> (i32, i32, i32) {
    %c0_i32 = arith.constant 0 : i32
    %c0_i32_0 = arith.constant 0 : i32
    %c0_i32_1 = arith.constant 0 : i32
    return %arg0, %c0_i32, %c0_i32_0 : i32, i32, i32
  }
}

module attributes {stable_mosaic.version = 11 : i64} {
  func.func @_affine_lrelu_kernel(%arg0: i32, %arg1: memref<128x8xbf16, #tpu.memory_space<vmem>>, %arg2: memref<1x8xf32, #tpu.memory_space<vmem>>, %arg3: memref<1x8xf32, #tpu.memory_space<vmem>>, %arg4: memref<128x8xf32, #tpu.memory_space<vmem>>) attributes {dimension_semantics = [#tpu.dimension_semantics<parallel>], iteration_bounds = array<i64: 1>, scalar_prefetch = 0 : i64, scratch_operands = 0 : i64, tpu.core_type = #tpu.core_type<tc>, window_params = [{transform_indices = @transform_0, window_bounds = array<i64: 128, 8>}, {pipeline_mode = #tpu.pipeline_mode<synchronous>, transform_indices = @transform_1, window_bounds = array<i64: 1, 8>}, {pipeline_mode = #tpu.pipeline_mode<synchronous>, transform_indices = @transform_2, window_bounds = array<i64: 1, 8>}, {transform_indices = @transform_3, window_bounds = array<i64: 128, 8>}]} {
    %c0 = arith.constant 0 : index
    %c0_0 = arith.constant 0 : index
    %0 = vector.load %arg1[%c0, %c0_0] : memref<128x8xbf16, #tpu.memory_space<vmem>>, vector<128x8xbf16>
    %1 = arith.extf %0 : vector<128x8xbf16> to vector<128x8xf32>
    %c0_1 = arith.constant 0 : index
    %c0_2 = arith.constant 0 : index
    %2 = vector.load %arg2[%c0_1, %c0_2] : memref<1x8xf32, #tpu.memory_space<vmem>>, vector<1x8xf32>
    %3 = vector.broadcast %2 : vector<1x8xf32> to vector<128x8xf32>
    %4 = arith.mulf %1, %3 : vector<128x8xf32>
    %c0_3 = arith.constant 0 : index
    %c0_4 = arith.constant 0 : index
    %5 = vector.load %arg3[%c0_3, %c0_4] : memref<1x8xf32, #tpu.memory_space<vmem>>, vector<1x8xf32>
    %6 = vector.broadcast %5 : vector<1x8xf32> to vector<128x8xf32>
    %7 = arith.addf %4, %6 : vector<128x8xf32>
    %cst = arith.constant 2.000000e-01 : f32
    %8 = vector.broadcast %cst : f32 to vector<128x8xf32>
    %9 = arith.mulf %8, %7 : vector<128x8xf32>
    %10 = arith.maximumf %7, %9 : vector<128x8xf32>
    %c0_5 = arith.constant 0 : index
    %c0_6 = arith.constant 0 : index
    %11 = vector.load %arg4[%c0_5, %c0_6] : memref<128x8xf32, #tpu.memory_space<vmem>>, vector<128x8xf32>
    tpu.vector_store %arg4[%c0_5, %c0_6], %10 {strides = array<i32>} : memref<128x8xf32, #tpu.memory_space<vmem>>, vector<128x8xf32>,
    return
  }
  func.func @transform_0(%arg0: i32) -> (i32, i32) {
    %c0_i32 = arith.constant 0 : i32
    %c0_i32_0 = arith.constant 0 : i32
    return %arg0, %c0_i32 : i32, i32
  }
  func.func @transform_1(%arg0: i32) -> (i32, i32) {
    %c0_i32 = arith.constant 0 : i32
    %c0_i32_0 = arith.constant 0 : i32
    %c0_i32_1 = arith.constant 0 : i32
    return %c0_i32, %c0_i32_0 : i32, i32
  }
  func.func @transform_2(%arg0: i32) -> (i32, i32) {
    %c0_i32 = arith.constant 0 : i32
    %c0_i32_0 = arith.constant 0 : i32
    %c0_i32_1 = arith.constant 0 : i32
    return %c0_i32, %c0_i32_0 : i32, i32
  }
  func.func @transform_3(%arg0: i32) -> (i32, i32) {
    %c0_i32 = arith.constant 0 : i32
    %c0_i32_0 = arith.constant 0 : i32
    return %arg0, %c0_i32 : i32, i32
  }
}

</mosaic_0001>

<bundles_post_ra>
// kernel: dcgan_block_forward.3
= control target key start
LH: loop header
LB: loop body
LE: loop exit
PB: predicated region body
PF: predicated region fallthrough
CT: control target
= control target key end

     0   :  { %8 = vsyncpa [#allocation3], 0  ;;  %s475_s0 = inlined_call_operand.hbm [shape: bf16[128,8], index: 0, kind: input, shape index: {}]   ;;  %s476_s1 = inlined_call_operand.hbm [shape: f32[1,8], index: 1, kind: input, shape index: {}]   ;;  %s477_s2 = inlined_call_operand.hbm [shape: f32[1,8], index: 2, kind: input, shape index: {}]   ;;  %s478_s3 = inlined_call_operand.hbm [shape: f32[128,8], index: 3, kind: output, shape index: {}]  }
   0x1   :  { %9 = vsyncpa [#allocation6], 0 }
   0x2   :  { %10 = vsyncpa [#allocation4], 0  ;;  %s340_s12 = smov [#allocation5]   ;;  %s341_s14 = smov [#allocation2]  }
   0x3   :  { %s29_s13 = sshll.u32 %s340_s12, 4  ;;  %s16_s15 = sshll.u32 %s341_s14, 4  ;;  %s30_s13 = int_to_ptr.vmem [resolvable:$true] %s29_s13  ;;  %s368_s15 = int_to_ptr.vmem [resolvable:$true] %s16_s15 }
   0x4   :  { %s246_s18 = scalar_lea.hbm %s476_s1, 16 }
   0x5   :  { %p247_p0 = scmp.ne.s32.totalorder %s476_s1, %s246_s18  ;;  %p250_p1 = scmp.lt.u32.totalorder %s246_s18, %s476_s1 }
   0x7   :  { %p252_p2 = pnand %p250_p1, %p247_p0 }
   0x9   :  { %255 = shalt.err (!%p252_p2)
}
   0xa   :  { %s256_s23 = scalar_lea.vmem %s30_s13, 16  ;;  %s260_s24 = scalar_lea.vmem %s30_s13, 32 }
   0xb   :  { %p257_p3 = scmp.ne.s32.totalorder %s30_s13, %s256_s23  ;;  %p261_p4 = scmp.lt.s32.totalorder %s30_s13, %s30_s13 }
   0xc   :  { %p262_p5 = scmp.lt.s32.totalorder %s260_s24, %s256_s23 }
   0xe   :  { %p263_p6 = por %p262_p5, %p261_p4 }
  0x10   :  { %p264_p7 = pnand %p263_p6, %p257_p3 }
  0x12   :  { %267 = shalt.err (!%p264_p7)
}
  0x13   :  { %32 = dma.hbm_to_vmem [thread:$0]  %s476_s1, 16, %s30_s13, [#allocation6]  }
  0x14   :  { %s268_s29 = scalar_lea.hbm %s475_s0, 1024 }
  0x15   :  { %p269_p8 = scmp.ne.s32.totalorder %s475_s0, %s268_s29  ;;  %p272_p9 = scmp.lt.u32.totalorder %s268_s29, %s475_s0 }
  0x17   :  { %p274_p10 = pnand %p272_p9, %p269_p8 }
  0x19   :  { %277 = shalt.err (!%p274_p10)
}
  0x1a   :  { %s278_s7 = scalar_lea.vmem %s368_s15, 1024  ;;  %p283_p12 = scmp.lt.s32.totalorder %s368_s15, %s368_s15 }
  0x1b   :  { %p279_p11 = scmp.ne.s32.totalorder %s368_s15, %s278_s7  ;;  %p284_p13 = scmp.lt.s32.totalorder %s278_s7, %s278_s7 }
  0x1d   :  { %p285_p0 = por %p284_p13, %p283_p12 }
  0x1f   :  { %p286_p1 = pnand %p285_p0, %p279_p11 }
  0x21   :  { %289 = shalt.err (!%p286_p1)
}
  0x22   :  { %s342_s1 = smov 64   ;;  %s343_s8 = smov 4  }
  0x23   :  { %22 = dma.hbm_to_vmem [thread:$0]  %s475_s0, 1024, %s368_s15, [#allocation3], %s342_s1, %s342_s1, %s343_s8  }
  0x24   :  { %s344_s11 = smov [#allocation7]   ;;  %s290_s16 = scalar_lea.hbm %s477_s2, 16 }
  0x25   :  { %s39_s12 = sshll.u32 %s344_s11, 4  ;;  %p291_p2 = scmp.ne.s32.totalorder %s477_s2, %s290_s16  ;;  %s40_s12 = int_to_ptr.vmem [resolvable:$true] %s39_s12 }
  0x26   :  { %p294_p3 = scmp.lt.u32.totalorder %s290_s16, %s477_s2 }
  0x28   :  { %p296_p4 = pnand %p294_p3, %p291_p2 }
  0x2a   :  { %299 = shalt.err (!%p296_p4)
}
  0x2b   :  { %s300_s21 = scalar_lea.vmem %s40_s12, 16  ;;  %s304_s0 = scalar_lea.vmem %s40_s12, 32 }
  0x2c   :  { %p301_p5 = scmp.ne.s32.totalorder %s40_s12, %s300_s21  ;;  %p305_p6 = scmp.lt.s32.totalorder %s40_s12, %s40_s12 }
  0x2d   :  { %p306_p7 = scmp.lt.s32.totalorder %s304_s0, %s300_s21 }
  0x2f   :  { %p307_p8 = por %p306_p7, %p305_p6 }
  0x31   :  { %p308_p9 = pnand %p307_p8, %p301_p5 }
  0x33   :  { %311 = shalt.err (!%p308_p9)
}
  0x34   :  { %42 = dma.hbm_to_vmem [thread:$0]  %s477_s2, 16, %s40_s12, [#allocation6]  }
  0x35   :  { %334 = dma.done.wait [#allocation3], 1024  }
  0x36   :  { %335 = vsyncadd [#allocation3], 4294966272 }
  0x37   :  { %336 = dma.done.wait [#allocation6], 32  }
  0x38   :  { %337 = vsyncadd [#allocation6], 4294967264  ;;  %v200_v0 = vld [vmem:[#allocation2] sm:$0xff]   ;;  %vm162_vm0 = vcmask 64512   ;;  %v231_v4 = vld [vmem:[#allocation2 + $0x8] sm:$0xff]   ;;  %s345_s2 = smov [#allocation8]  }
  0x39   :  { %v411_v1 = vld [vmem:[#allocation5] ss:$0 sm:$0xff]  ;;  %v201_v2 = vunpack.c.l.bf16 %v200_v0  ;;  %v202_v3 = vunpack.c.h.bf16 %v200_v0  ;;  %v232_v5 = vld [vmem:[#allocation2 + $0x10] sm:$0xff]   ;;  %v233_v6 = vld [vmem:[#allocation2 + $0x18] sm:$0xff]   ;;  %v205_v8 = vunpack.c.l.bf16 %v231_v4  ;;  %v206_v9 = vunpack.c.h.bf16 %v231_v4  ;;  %s184_s23 = sshll.u32 %s345_s2, 4  ;;  %s185_s23 = int_to_ptr.vmem [resolvable:$true] %s184_s23 }
  0x3a   :  { %v413_v7 = vld [vmem:[#allocation7] ss:$0 sm:$0xff]  ;;  %v209_v10 = vunpack.c.l.bf16 %v232_v5  ;;  %v210_v11 = vunpack.c.h.bf16 %v232_v5  ;;  %v213_v14 = vunpack.c.l.bf16 %v233_v6  ;;  %v214_v15 = vunpack.c.h.bf16 %v233_v6  ;;  %v235_v41 = vld [vmem:[#allocation2 + $0x28] sm:$0xff]   ;;  %v236_v42 = vld [vmem:[#allocation2 + $0x30] sm:$0xff]   ;;  %s312_s24 = scalar_lea.vmem %s185_s23, 2048  ;;  %p317_p11 = scmp.lt.s32.totalorder %s185_s23, %s185_s23 }
  0x3b   :  { %v91_v12 = vmul.f32 %v201_v2, %v411_v1  ;;  %v92_v13 = vmul.f32 %v202_v3, %v411_v1  ;;  %v93_v16 = vmul.f32 %v205_v8, %v411_v1  ;;  %v94_v17 = vmul.f32 %v206_v9, %v411_v1  ;;  %v234_v24 = vld [vmem:[#allocation2 + $0x20] sm:$0xff]   ;;  %v237_v47 = vld [vmem:[#allocation2 + $0x38] sm:$0xff]   ;;  %p313_p10 = scmp.ne.s32.totalorder %s185_s23, %s312_s24  ;;  %p318_p12 = scmp.lt.s32.totalorder %s312_s24, %s312_s24 }
  0x3c   :  { %v95_v18 = vmul.f32 %v209_v10, %v411_v1  ;;  %v96_v19 = vmul.f32 %v210_v11, %v411_v1  ;;  %v97_v22 = vmul.f32 %v213_v14, %v411_v1  ;;  %v98_v23 = vmul.f32 %v214_v15, %v411_v1 }
  0x3d   :  { %v114_v20 = vadd.f32 %v413_v7, %v91_v12  ;;  %v115_v21 = vadd.f32 %v413_v7, %v92_v13  ;;  %v116_v25 = vadd.f32 %v413_v7, %v93_v16  ;;  %v117_v26 = vadd.f32 %v413_v7, %v94_v17  ;;  %p319_p13 = por %p318_p12, %p317_p11 }
  0x3e   :  { %v118_v27 = vadd.f32 %v413_v7, %v95_v18  ;;  %v119_v28 = vadd.f32 %v413_v7, %v96_v19  ;;  %v120_v31 = vadd.f32 %v413_v7, %v97_v22  ;;  %v121_v32 = vadd.f32 %v413_v7, %v98_v23 }
  0x3f   :  { %v130_v29 = vmul.f32 0.2, %v114_v20  ;;  %v131_v30 = vmul.f32 0.2, %v115_v21  ;;  %v132_v33 = vmul.f32 0.2, %v116_v25  ;;  %v217_v36 = vunpack.c.l.bf16 %v234_v24  ;;  %p320_p0 = pnand %p319_p13, %p313_p10 }
  0x40   :  { %v133_v34 = vmul.f32 0.2, %v117_v26  ;;  %v134_v35 = vmul.f32 0.2, %v118_v27  ;;  %v135_v39 = vmul.f32 0.2, %v119_v28  ;;  %v218_v51 = vunpack.c.h.bf16 %v234_v24 }
  0x41   :  { %v146_v37 = vmax.f32 %v114_v20, %v130_v29  ;;  %v147_v38 = vmax.f32 %v115_v21, %v131_v30  ;;  %v136_v40 = vmul.f32 0.2, %v120_v31  ;;  %v148_v43 = vmax.f32 %v116_v25, %v132_v33 }
  0x42   :  { %v149_v44 = vmax.f32 %v117_v26, %v133_v34  ;;  %v150_v45 = vmax.f32 %v118_v27, %v134_v35  ;;  %v137_v46 = vmul.f32 0.2, %v121_v32  ;;  %v151_v48 = vmax.f32 %v119_v28, %v135_v39 }
  0x43   :  { %163 = vst.msk [vmem:[#allocation8] sm:$0xff] %vm162_vm0, %v146_v37  ;;  %164 = vst.msk [vmem:[#allocation8 + $0x8] sm:$0xff] %vm162_vm0, %v147_v38  ;;  %v152_v49 = vmax.f32 %v120_v31, %v136_v40  ;;  %v99_v50 = vmul.f32 %v217_v36, %v411_v1  ;;  %v221_v53 = vunpack.c.l.bf16 %v235_v41  ;;  %v222_v54 = vunpack.c.h.bf16 %v235_v41 }
  0x44   :  { %165 = vst.msk [vmem:[#allocation8 + $0x10] sm:$0xff] %vm162_vm0, %v148_v43  ;;  %166 = vst.msk [vmem:[#allocation8 + $0x18] sm:$0xff] %vm162_vm0, %v149_v44  ;;  %v153_v52 = vmax.f32 %v121_v32, %v137_v46  ;;  %v225_v55 = vunpack.c.l.bf16 %v236_v42  ;;  %v100_v57 = vmul.f32 %v218_v51, %v411_v1  ;;  %v226_v58 = vunpack.c.h.bf16 %v236_v42 }
  0x45   :  { %167 = vst.msk [vmem:[#allocation8 + $0x20] sm:$0xff] %vm162_vm0, %v150_v45  ;;  %168 = vst.msk [vmem:[#allocation8 + $0x28] sm:$0xff] %vm162_vm0, %v151_v48  ;;  %v122_v56 = vadd.f32 %v413_v7, %v99_v50  ;;  %v229_v59 = vunpack.c.l.bf16 %v237_v47  ;;  %v101_v60 = vmul.f32 %v221_v53, %v411_v1  ;;  %v102_v61 = vmul.f32 %v222_v54, %v411_v1 }
  0x46   :  { %169 = vst.msk [vmem:[#allocation8 + $0x30] sm:$0xff] %vm162_vm0, %v152_v49  ;;  %170 = vst.msk [vmem:[#allocation8 + $0x38] sm:$0xff] %vm162_vm0, %v153_v52  ;;  %v103_v62 = vmul.f32 %v225_v55, %v411_v1  ;;  %v230_v63 = vunpack.c.h.bf16 %v237_v47  ;;  %v123_v2 = vadd.f32 %v413_v7, %v100_v57  ;;  %v104_v3 = vmul.f32 %v226_v58, %v411_v1 }
  0x47   :  { %v138_v0 = vmul.f32 0.2, %v122_v56  ;;  %v105_v4 = vmul.f32 %v229_v59, %v411_v1  ;;  %v124_v5 = vadd.f32 %v413_v7, %v101_v60  ;;  %v125_v6 = vadd.f32 %v413_v7, %v102_v61 }
  0x48   :  { %v126_v8 = vadd.f32 %v413_v7, %v103_v62  ;;  %v106_v9 = vmul.f32 %v230_v63, %v411_v1  ;;  %v139_v11 = vmul.f32 0.2, %v123_v2  ;;  %v127_v12 = vadd.f32 %v413_v7, %v104_v3 }
  0x49   :  { %v154_v10 = vmax.f32 %v122_v56, %v138_v0  ;;  %v128_v13 = vadd.f32 %v413_v7, %v105_v4  ;;  %v140_v14 = vmul.f32 0.2, %v124_v5  ;;  %v141_v15 = vmul.f32 0.2, %v125_v6 }
  0x4a   :  { %v142_v16 = vmul.f32 0.2, %v126_v8  ;;  %v129_v17 = vadd.f32 %v413_v7, %v106_v9  ;;  %v155_v18 = vmax.f32 %v123_v2, %v139_v11  ;;  %v143_v19 = vmul.f32 0.2, %v127_v12 }
  0x4b   :  { %171 = vst.msk [vmem:[#allocation8 + $0x40] sm:$0xff] %vm162_vm0, %v154_v10  ;;  %v144_v20 = vmul.f32 0.2, %v128_v13  ;;  %v156_v21 = vmax.f32 %v124_v5, %v140_v14  ;;  %v157_v1 = vmax.f32 %v125_v6, %v141_v15 }
  0x4c   :  { %v158_v22 = vmax.f32 %v126_v8, %v142_v16  ;;  %v145_v23 = vmul.f32 0.2, %v129_v17  ;;  %172 = vst.msk [vmem:[#allocation8 + $0x48] sm:$0xff] %vm162_vm0, %v155_v18  ;;  %v159_v24 = vmax.f32 %v127_v12, %v143_v19 }
  0x4d   :  { %v160_v25 = vmax.f32 %v128_v13, %v144_v20  ;;  %173 = vst.msk [vmem:[#allocation8 + $0x50] sm:$0xff] %vm162_vm0, %v156_v21  ;;  %174 = vst.msk [vmem:[#allocation8 + $0x58] sm:$0xff] %vm162_vm0, %v157_v1 }
  0x4e   :  { %175 = vst.msk [vmem:[#allocation8 + $0x60] sm:$0xff] %vm162_vm0, %v158_v22  ;;  %v161_v7 = vmax.f32 %v129_v17, %v145_v23  ;;  %176 = vst.msk [vmem:[#allocation8 + $0x68] sm:$0xff] %vm162_vm0, %v159_v24 }
  0x4f   :  { %177 = vst.msk [vmem:[#allocation8 + $0x70] sm:$0xff] %vm162_vm0, %v160_v25 }
  0x50   :  { %178 = vst.msk [vmem:[#allocation8 + $0x78] sm:$0xff] %vm162_vm0, %v161_v7 }
  0x51   :  { %323 = shalt.err (!%p320_p0)
}
  0x52   :  { %s324_s27 = scalar_lea.hbm %s478_s3, 2048 }
  0x53   :  { %p325_p1 = scmp.ne.s32.totalorder %s478_s3, %s324_s27  ;;  %p328_p2 = scmp.lt.u32.totalorder %s324_s27, %s478_s3 }
  0x55   :  { %p330_p3 = pnand %p328_p2, %p325_p1 }
  0x57   :  { %333 = shalt.err (!%p330_p3)
}
  0x58   :  { %s346_s5 = smov 128   ;;  %s347_s6 = smov 8  }
  0x59   :  { %190 = dma.vmem_to_hbm [thread:$0]  %s185_s23, 2048, %s478_s3, [#allocation4], %s346_s5, %s346_s5, %s347_s6  }
  0x5a   :  { %338 = dma.done.wait [#allocation4], 2048  }
  0x5b   :  { %339 = vsyncadd [#allocation4], 4294965248 }
  0x5c   :  { %194 = vsyncpa [#allocation3], 1 }
  0x5d   :  { %195 = vsyncpa [#allocation6], 1 }
  0x5e   :  { %196 = vsyncpa [#allocation4], 1 }

// kernel: dcgan_block_forward.2
= control target key start
LH: loop header
LB: loop body
LE: loop exit
PB: predicated region body
PF: predicated region fallthrough
CT: control target
= control target key end

     0   :  { %10 = vsyncpa [#allocation3], 0  ;;  %s958_s0 = inlined_call_operand.hbm [shape: bf16[128,64], index: 0, kind: input, shape index: {}]   ;;  %s959_s1 = inlined_call_operand.hbm [shape: bf16[64,8], index: 1, kind: input, shape index: {}]   ;;  %s960_s2 = inlined_call_operand.hbm [shape: bf16[128,8], index: 2, kind: output, shape index: {0}]   ;;  %s961_s3 = inlined_call_operand.hbm [shape: f32[1,1,8], index: 3, kind: output, shape index: {1}]   ;;  %s962_s4 = inlined_call_operand.hbm [shape: f32[1,1,8], index: 4, kind: output, shape index: {2}]  }
   0x1   :  { %11 = vsyncpa [#allocation6], 0 }
   0x2   :  { %12 = vsyncpa [#allocation4], 0 }
   0x3   :  { %13 = vsyncpa [#allocation9], 0  ;;  %s732_s15 = smov [#allocation2]   ;;  %s614_s19 = scalar_lea.hbm %s958_s0, 1024 }
   0x4   :  { %s23_s16 = sshll.u32 %s732_s15, 4  ;;  %p615_p0 = scmp.ne.s32.totalorder %s958_s0, %s614_s19  ;;  %s24_s16 = int_to_ptr.vmem [resolvable:$true] %s23_s16 }
   0x5   :  { %p618_p1 = scmp.lt.u32.totalorder %s614_s19, %s958_s0 }
   0x7   :  { %p620_p2 = pnand %p618_p1, %p615_p0 }
   0x9   :  { %623 = shalt.err (!%p620_p2)
}
   0xa   :  { %s624_s24 = scalar_lea.vmem %s24_s16, 1024  ;;  %p629_p4 = scmp.lt.s32.totalorder %s24_s16, %s24_s16 }
   0xb   :  { %p625_p3 = scmp.ne.s32.totalorder %s24_s16, %s624_s24  ;;  %p630_p5 = scmp.lt.s32.totalorder %s624_s24, %s624_s24 }
   0xd   :  { %p631_p6 = por %p630_p5, %p629_p4 }
   0xf   :  { %p632_p7 = pnand %p631_p6, %p625_p3 }
  0x11   :  { %635 = shalt.err (!%p632_p7)
}
  0x12   :  { %s733_s25 = smov 64   ;;  %s734_s26 = smov 4  }
  0x13   :  { %29 = dma.hbm_to_vmem [thread:$0]  %s958_s0, 1024, %s24_s16, [#allocation3], %s733_s25, %s733_s25, %s734_s26  }
  0x14   :  { %s735_s29 = smov [#allocation5]   ;;  %s636_s7 = scalar_lea.hbm %s959_s1, 512 }
  0x15   :  { %s35_s30 = sshll.u32 %s735_s29, 4  ;;  %p637_p8 = scmp.ne.s32.totalorder %s959_s1, %s636_s7  ;;  %s36_s30 = int_to_ptr.vmem [resolvable:$true] %s35_s30 }
  0x16   :  { %p640_p9 = scmp.lt.u32.totalorder %s636_s7, %s959_s1 }
  0x18   :  { %p642_p10 = pnand %p640_p9, %p637_p8 }
  0x1a   :  { %645 = shalt.err (!%p642_p10)
}
  0x1b   :  { %s646_s12 = scalar_lea.vmem %s36_s30, 512  ;;  %p651_p12 = scmp.lt.s32.totalorder %s36_s30, %s36_s30 }
  0x1c   :  { %p647_p11 = scmp.ne.s32.totalorder %s36_s30, %s646_s12  ;;  %p652_p13 = scmp.lt.s32.totalorder %s646_s12, %s646_s12 }
  0x1e   :  { %p653_p0 = por %p652_p13, %p651_p12 }
  0x20   :  { %p654_p1 = pnand %p653_p0, %p647_p11 }
  0x22   :  { %657 = shalt.err (!%p654_p1)
}
  0x23   :  { %41 = dma.hbm_to_vmem [thread:$0]  %s959_s1, 512, %s36_s30, [#allocation6], %s733_s25, %s733_s25, %s734_s26  }
  0x24   :  { %724 = dma.done.wait [#allocation3], 1024  }
  0x25   :  { %725 = vsyncadd [#allocation3], 4294966272 }
  0x26   :  { %726 = dma.done.wait [#allocation6], 512  }
  0x27   :  { %727 = vsyncadd [#allocation6], 4294966784  ;;  %v602_v0 = vld [vmem:[#allocation5] sm:$0xff]   ;;  %v603_v1 = vld [vmem:[#allocation5 + $0x8] sm:$0xff]   ;;  %vm148_vm0 = vcmask 523264   ;;  %vm57_vm1 = vcmask 57344  }
  0x28   :  { %562 = vmatprep.subr.bf16.mxu0 %v602_v0  ;;  %586 = vmatprep.subr.bf16.mxu1 %v602_v0  ;;  %v604_v2 = vld [vmem:[#allocation5 + $0x10] sm:$0xff]   ;;  %v606_v3 = vld [vmem:[#allocation2] sm:$0xff]   ;;  %v605_v4 = vld [vmem:[#allocation5 + $0x18] sm:$0xff]   ;;  %v736_v12 = vmov 0.0   ;;  %vm334_vm2 = vcmask 60416   ;;  %vm352_vm3 = vcmask 64512  }
  0x29   :  { %563 = vmatpush3.bf16.msra.mxu0 %v602_v0  ;;  %590 = vmatpush3.bf16.msra.mxu1 %v602_v0  ;;  %v610_v5 = vld [vmem:[#allocation2 + $0x20] sm:$0xff]   ;;  %v607_v6 = vld [vmem:[#allocation2 + $0x8] sm:$0xff]   ;;  %v608_v8 = vld [vmem:[#allocation2 + $0x10] sm:$0xff]   ;;  %58 = vst.msk [vmem:[#allocation8] sm:$0x1] %vm57_vm1, %v736_v12  ;;  %s737_s1 = smov [#allocation7]  }
  0x2a   :  { %564 = vmatprep.subr.bf16.mxu0 %v603_v1  ;;  %587 = vmatprep.subr.bf16.mxu1 %v603_v1  ;;  %v611_v7 = vld [vmem:[#allocation2 + $0x28] sm:$0xff]   ;;  %v612_v9 = vld [vmem:[#allocation2 + $0x30] sm:$0xff]   ;;  %v609_v10 = vld [vmem:[#allocation2 + $0x18] sm:$0xff]   ;;  %59 = vst.msk [vmem:[#allocation10] sm:$0x1] %vm57_vm1, %v736_v12  ;;  %s458_s14 = sshll.u32 %s737_s1, 4  ;;  %s459_s14 = int_to_ptr.vmem [resolvable:$true] %s458_s14 }
  0x2b   :  { %570 = vmatprep.mubr.msk.bf16.mxu0 %vm148_vm0, %v606_v3  ;;  %578 = vmatprep.mubr.msk.bf16.mxu1 %vm148_vm0, %v610_v5  ;;  %v613_v11 = vld [vmem:[#allocation2 + $0x38] sm:$0xff]   ;;  %s658_s15 = scalar_lea.vmem %s459_s14, 1024  ;;  %p663_p3 = scmp.lt.s32.totalorder %s459_s14, %s459_s14 }
  0x2c   :  { %p659_p2 = scmp.ne.s32.totalorder %s459_s14, %s658_s15  ;;  %p664_p4 = scmp.lt.s32.totalorder %s658_s15, %s658_s15 }
  0x2d   :  { %565 = vmatpush3.bf16.msra.mxu0 %v603_v1  ;;  %591 = vmatpush3.bf16.msra.mxu1 %v603_v1 }
  0x2e   :  { %566 = vmatprep.subr.bf16.mxu0 %v604_v2  ;;  %588 = vmatprep.subr.bf16.mxu1 %v604_v2  ;;  %p665_p5 = por %p664_p4, %p663_p3 }
  0x30   :  { %p666_p6 = pnand %p665_p5, %p659_p2 }
  0x31   :  { %567 = vmatpush3.bf16.msra.mxu0 %v604_v2  ;;  %592 = vmatpush3.bf16.msra.mxu1 %v604_v2 }
  0x32   :  { %568 = vmatprep.subr.bf16.mxu0 %v605_v4  ;;  %589 = vmatprep.subr.bf16.mxu1 %v605_v4 }
  0x35   :  { %569 = vmatpush3.bf16.msra.mxu0 %v605_v4  ;;  %593 = vmatpush3.bf16.msra.mxu1 %v605_v4 }
  0x38   :  { %571 = vmatmul.mubr.msk.bf16.vlgmr.msra.gmra.mrb[0].mxu0 %vm148_vm0, %v607_v6  ;;  %579 = vmatmul.mubr.msk.bf16.vlgmr.msra.gmra.mrb[0].mxu1 %vm148_vm0, %v611_v7 }
  0x39   :  { %574 = vmatprep.mubr.msk.bf16.mxu0 %vm148_vm0, %v608_v8  ;;  %582 = vmatprep.mubr.msk.bf16.mxu1 %vm148_vm0, %v612_v9 }
  0x40   :  { %575 = vmatmul.mubr.msk.bf16.gmra.mrb[4].mxu0 %vm148_vm0, %v609_v10  ;;  %583 = vmatmul.mubr.msk.bf16.gmra.mrb[4].mxu1 %vm148_vm0, %v613_v11 }
 0x10b   :  { %v572_v13 = vpop.f32.mrb[0].mxu0  ;;  %v805_v14 = vpop.f32.mrb[0].mxu1 }
 0x10c   :  { %v536_v15 = vpack.c.bf16 %v572_v13, %v572_v13  ;;  %v207_v16 = vpop.f32.mrb[1].mxu0  ;;  %v544_v17 = vpack.c.bf16 %v805_v14, %v805_v14  ;;  %v809_v18 = vpop.f32.mrb[1].mxu1  ;;  %v396_v23 = vmul.f32 %v572_v13, %v572_v13  ;;  %v356_v34 = vsel %vm352_vm3, %v572_v13, 0.0 }
 0x10d   :  { %v534_v19 = vpack.c.bf16 %v207_v16, %v207_v16  ;;  %v394_v20 = vmul.f32 %v207_v16, %v207_v16  ;;  %v573_v21 = vpop.f32.mrb[2].mxu0  ;;  %v811_v22 = vpop.f32.mrb[2].mxu1  ;;  %v353_v27 = vsel %vm352_vm3, %v207_v16, 0.0  ;;  %v542_v33 = vpack.c.bf16 %v809_v18, %v809_v18 }
 0x10e   :  { %337 = vst.msk [vmem:[#allocation7 + $0x8] sm:$0xf] %vm334_vm2, %v536_v15  ;;  %v537_v24 = vpack.c.bf16 %v573_v21, %v573_v21  ;;  %v210_v25 = vpop.f32.mrb[3].mxu0  ;;  %345 = vst.msk [vmem:[#allocation7 + $0x28] sm:$0xf] %vm334_vm2, %v544_v17  ;;  %v815_v26 = vpop.f32.mrb[3].mxu1  ;;  %v397_v31 = vmul.f32 %v573_v21, %v573_v21  ;;  %v545_v37 = vpack.c.bf16 %v811_v22, %v811_v22 }
 0x10f   :  { %335 = vst.msk [vmem:[#allocation7] sm:$0xf] %vm334_vm2, %v534_v19  ;;  %v535_v28 = vpack.c.bf16 %v210_v25, %v210_v25  ;;  %v354_v29 = vsel %vm352_vm3, %v210_v25, 0.0  ;;  %v395_v30 = vmul.f32 %v210_v25, %v210_v25  ;;  %v410_v35 = vsel %vm352_vm3, %v394_v20, 0.0  ;;  %343 = vst.msk [vmem:[#allocation7 + $0x20] sm:$0xf] %vm334_vm2, %v542_v33 }
 0x110   :  { %338 = vst.msk [vmem:[#allocation7 + $0xc] sm:$0xf] %vm334_vm2, %v537_v24  ;;  %v355_v32 = vadd.f32 %v354_v29, %v353_v27  ;;  %v413_v40 = vsel %vm352_vm3, %v396_v23, 0.0  ;;  %346 = vst.msk [vmem:[#allocation7 + $0x2c] sm:$0xf] %vm334_vm2, %v545_v37  ;;  %v543_v42 = vpack.c.bf16 %v815_v26, %v815_v26  ;;  %v358_v44 = vsel %vm352_vm3, %v573_v21, 0.0 }
 0x111   :  { %336 = vst.msk [vmem:[#allocation7 + $0x4] sm:$0xf] %vm334_vm2, %v535_v28  ;;  %v411_v36 = vsel %vm352_vm3, %v395_v30, 0.0  ;;  %v415_v45 = vsel %vm352_vm3, %v397_v31, 0.0  ;;  %v402_v4 = vmul.f32 %v809_v18, %v809_v18  ;;  %v368_v15 = vsel %vm352_vm3, %v809_v18, 0.0 }
 0x112   :  { %v357_v38 = vadd.f32 %v356_v34, %v355_v32  ;;  %v412_v39 = vadd.f32 %v411_v36, %v410_v35  ;;  %344 = vst.msk [vmem:[#allocation7 + $0x24] sm:$0xf] %vm334_vm2, %v543_v42  ;;  %v403_v24 = vmul.f32 %v815_v26, %v815_v26  ;;  %v404_v27 = vmul.f32 %v805_v14, %v805_v14 }
 0x113   :  { %v576_v41 = vpop.f32.mrb[4].mxu0  ;;  %v834_v43 = vpop.f32.mrb[4].mxu1  ;;  %v425_v23 = vsel %vm352_vm3, %v402_v4, 0.0  ;;  %v370_v28 = vsel %vm352_vm3, %v815_v26, 0.0 }
 0x114   :  { %v414_v46 = vadd.f32 %v413_v40, %v412_v39  ;;  %v540_v47 = vpack.c.bf16 %v576_v41, %v576_v41  ;;  %v223_v48 = vpop.f32.mrb[5].mxu0  ;;  %v838_v49 = vpop.f32.mrb[5].mxu1  ;;  %v359_v51 = vadd.f32 %v358_v44, %v357_v38  ;;  %v400_v63 = vmul.f32 %v576_v41, %v576_v41 }
 0x115   :  { %v538_v50 = vpack.c.bf16 %v223_v48, %v223_v48  ;;  %v360_v52 = vsel %vm352_vm3, %v223_v48, 0.0  ;;  %v398_v53 = vmul.f32 %v223_v48, %v223_v48  ;;  %v577_v54 = vpop.f32.mrb[6].mxu0  ;;  %v842_v55 = vpop.f32.mrb[6].mxu1  ;;  %v548_v5 = vpack.c.bf16 %v834_v43, %v834_v43 }
 0x116   :  { %341 = vst.msk [vmem:[#allocation7 + $0x18] sm:$0xf] %vm334_vm2, %v540_v47  ;;  %v416_v56 = vadd.f32 %v415_v45, %v414_v46  ;;  %v541_v57 = vpack.c.bf16 %v577_v54, %v577_v54  ;;  %v226_v58 = vpop.f32.mrb[7].mxu0  ;;  %v845_v59 = vpop.f32.mrb[7].mxu1  ;;  %v361_v60 = vadd.f32 %v360_v52, %v359_v51  ;;  %v364_v6 = vsel %vm352_vm3, %v576_v41, 0.0 }
 0x117   :  { %339 = vst.msk [vmem:[#allocation7 + $0x10] sm:$0xf] %vm334_vm2, %v538_v50  ;;  %v417_v61 = vsel %vm352_vm3, %v398_v53, 0.0  ;;  %v539_v62 = vpack.c.bf16 %v226_v58, %v226_v58  ;;  %v362_v1 = vsel %vm352_vm3, %v226_v58, 0.0  ;;  %v399_v2 = vmul.f32 %v226_v58, %v226_v58  ;;  %349 = vst.msk [vmem:[#allocation7 + $0x38] sm:$0xf] %vm334_vm2, %v548_v5 }
 0x118   :  { %v418_v0 = vadd.f32 %v417_v61, %v416_v56  ;;  %342 = vst.msk [vmem:[#allocation7 + $0x1c] sm:$0xf] %vm334_vm2, %v541_v57  ;;  %v363_v3 = vadd.f32 %v362_v1, %v361_v60  ;;  %v401_v7 = vmul.f32 %v577_v54, %v577_v54  ;;  %v546_v9 = vpack.c.bf16 %v838_v49, %v838_v49 }
 0x119   :  { %340 = vst.msk [vmem:[#allocation7 + $0x14] sm:$0xf] %vm334_vm2, %v539_v62  ;;  %v419_v8 = vsel %vm352_vm3, %v399_v2, 0.0  ;;  %v421_v12 = vsel %vm352_vm3, %v400_v63, 0.0  ;;  %v366_v13 = vsel %vm352_vm3, %v577_v54, 0.0  ;;  %v549_v16 = vpack.c.bf16 %v842_v55, %v842_v55 }
 0x11a   :  { %v365_v10 = vadd.f32 %v364_v6, %v363_v3  ;;  %v420_v11 = vadd.f32 %v419_v8, %v418_v0  ;;  %347 = vst.msk [vmem:[#allocation7 + $0x30] sm:$0xf] %vm334_vm2, %v546_v9  ;;  %v547_v20 = vpack.c.bf16 %v845_v59, %v845_v59  ;;  %v423_v21 = vsel %vm352_vm3, %v401_v7, 0.0 }
 0x11b   :  { %350 = vst.msk [vmem:[#allocation7 + $0x3c] sm:$0xf] %vm334_vm2, %v549_v16 }
 0x11c   :  { %v422_v17 = vadd.f32 %v421_v12, %v420_v11  ;;  %v367_v19 = vadd.f32 %v366_v13, %v365_v10  ;;  %348 = vst.msk [vmem:[#allocation7 + $0x34] sm:$0xf] %vm334_vm2, %v547_v20 }
 0x11e   :  { %v369_v18 = vadd.f32 %v368_v15, %v367_v19  ;;  %v424_v25 = vadd.f32 %v423_v21, %v422_v17 }
 0x11f   :  { %669 = shalt.err (!%p666_p6)
}
 0x120   :  { %s670_s18 = scalar_lea.hbm %s960_s2, 1024 }
 0x121   :  { %p671_p7 = scmp.ne.s32.totalorder %s960_s2, %s670_s18  ;;  %p674_p8 = scmp.lt.u32.totalorder %s670_s18, %s960_s2 }
 0x123   :  { %p676_p9 = pnand %p674_p8, %p671_p7 }
 0x125   :  { %679 = shalt.err (!%p676_p9)
}
 0x126   :  { %464 = dma.vmem_to_hbm [thread:$0]  %s459_s14, 1024, %s960_s2, [#allocation4], %s733_s25, %s733_s25, %s734_s26   ;;  %v426_v26 = vadd.f32 %v425_v23, %v424_v25  ;;  %v371_v29 = vadd.f32 %v370_v28, %v369_v18  ;;  %v372_v30 = vsel %vm352_vm3, %v805_v14, 0.0  ;;  %v405_v31 = vmul.f32 %v811_v22, %v811_v22  ;;  %v351_v5 = vld [vmem:[#allocation8] sm:$0x1] }
 0x127   :  { %v427_v32 = vsel %vm352_vm3, %v403_v24, 0.0  ;;  %v406_v33 = vmul.f32 %v838_v49, %v838_v49  ;;  %v429_v36 = vsel %vm352_vm3, %v404_v27, 0.0  ;;  %v374_v37 = vsel %vm352_vm3, %v811_v22, 0.0  ;;  %s738_s2 = smov [#allocation8]   ;;  %s739_s26 = smov [#allocation10]  }
 0x128   :  { %v373_v34 = vadd.f32 %v372_v30, %v371_v29  ;;  %v428_v35 = vadd.f32 %v427_v32, %v426_v26  ;;  %v376_v38 = vsel %vm352_vm3, %v838_v49, 0.0  ;;  %v431_v40 = vsel %vm352_vm3, %v405_v31, 0.0  ;;  %s471_s25 = sshll.u32 %s738_s2, 4  ;;  %s481_s27 = sshll.u32 %s739_s26, 4  ;;  %s472_s25 = int_to_ptr.vmem [resolvable:$true] %s471_s25  ;;  %s925_s27 = int_to_ptr.vmem [resolvable:$true] %s481_s27 }
 0x129   :  { %v433_v41 = vsel %vm352_vm3, %v406_v33, 0.0  ;;  %v407_v42 = vmul.f32 %v845_v59, %v845_v59  ;;  %v408_v46 = vmul.f32 %v834_v43, %v834_v43  ;;  %v378_v22 = vsel %vm352_vm3, %v845_v59, 0.0  ;;  %s680_s28 = scalar_lea.vmem %s472_s25, 16  ;;  %s684_s29 = scalar_lea.vmem %s472_s25, 32 }
 0x12a   :  { %v430_v39 = vadd.f32 %v429_v36, %v428_v35  ;;  %v375_v14 = vadd.f32 %v374_v37, %v373_v34  ;;  %v380_v49 = vsel %vm352_vm3, %v834_v43, 0.0  ;;  %v409_v50 = vmul.f32 %v842_v55, %v842_v55  ;;  %p681_p10 = scmp.ne.s32.totalorder %s472_s25, %s680_s28  ;;  %p685_p11 = scmp.lt.s32.totalorder %s472_s25, %s472_s25 }
 0x12b   :  { %v435_v51 = vsel %vm352_vm3, %v407_v42, 0.0  ;;  %v437_v54 = vsel %vm352_vm3, %v408_v46, 0.0  ;;  %v382_v56 = vsel %vm352_vm3, %v842_v55, 0.0  ;;  %v393_v55 = vld [vmem:[#allocation10] sm:$0x1]  ;;  %p686_p12 = scmp.lt.s32.totalorder %s684_s29, %s680_s28 }
 0x12c   :  { %v377_v44 = vadd.f32 %v376_v38, %v375_v14  ;;  %v432_v45 = vadd.f32 %v431_v40, %v430_v39  ;;  %v439_v59 = vsel %vm352_vm3, %v409_v50, 0.0 }
 0x12d   :  { %p687_p13 = por %p686_p12, %p685_p11 }
 0x12e   :  { %v434_v47 = vadd.f32 %v433_v41, %v432_v45  ;;  %v379_v48 = vadd.f32 %v378_v22, %v377_v44 }
 0x12f   :  { %p688_p0 = pnand %p687_p13, %p681_p10 }
 0x130   :  { %v381_v52 = vadd.f32 %v380_v49, %v379_v48  ;;  %v436_v53 = vadd.f32 %v435_v51, %v434_v47 }
 0x132   :  { %v383_v57 = vadd.f32 %v382_v56, %v381_v52  ;;  %v438_v58 = vadd.f32 %v437_v54, %v436_v53 }
 0x134   :  { %v384_v60 = vrot.slane %v383_v57, 4  ;;  %v440_v61 = vadd.f32 %v439_v59, %v438_v58 }
 0x136   :  { %v385_v62 = vadd.f32 %v384_v60, %v383_v57  ;;  %v441_v43 = vrot.slane %v440_v61, 4 }
 0x138   :  { %v386_v63 = vrot.slane %v385_v62, 2  ;;  %v442_v0 = vadd.f32 %v441_v43, %v440_v61 }
 0x13a   :  { %v387_v1 = vadd.f32 %v386_v63, %v385_v62  ;;  %v443_v2 = vrot.slane %v442_v0, 2 }
 0x13c   :  { %v388_v3 = vrot.slane %v387_v1, 1  ;;  %v444_v4 = vadd.f32 %v443_v2, %v442_v0 }
 0x13e   :  { %v389_v6 = vadd.f32 %v388_v3, %v387_v1  ;;  %v445_v7 = vrot.slane %v444_v4, 1 }
 0x140   :  { %v390_v8 = vadd.f32 %v389_v6, %v351_v5  ;;  %v446_v9 = vadd.f32 %v445_v7, %v444_v4 }
 0x142   :  { %392 = vst.msk [vmem:[#allocation8] sm:$0x1] %vm57_vm1, %v390_v8  ;;  %v447_v10 = vadd.f32 %v446_v9, %v393_v55 }
 0x143   :  { %691 = shalt.err (!%p688_p0)
}
 0x144   :  { %s692_s6 = scalar_lea.hbm %s961_s3, 16 }
 0x145   :  { %p693_p1 = scmp.ne.s32.totalorder %s961_s3, %s692_s6  ;;  %p696_p2 = scmp.lt.u32.totalorder %s692_s6, %s961_s3 }
 0x147   :  { %p698_p3 = pnand %p696_p2, %p693_p1 }
 0x149   :  { %701 = shalt.err (!%p698_p3)
}
 0x14a   :  { %474 = dma.vmem_to_hbm [thread:$0]  %s472_s25, 16, %s961_s3, [#allocation9]   ;;  %448 = vst.msk [vmem:[#allocation10] sm:$0x1] %vm57_vm1, %v447_v10 }
 0x14b   :  { %s702_s0 = scalar_lea.vmem %s925_s27, 16  ;;  %s706_s13 = scalar_lea.vmem %s925_s27, 32 }
 0x14c   :  { %p703_p4 = scmp.ne.s32.totalorder %s925_s27, %s702_s0  ;;  %p707_p5 = scmp.lt.s32.totalorder %s925_s27, %s925_s27 }
 0x14d   :  { %p708_p6 = scmp.lt.s32.totalorder %s706_s13, %s702_s0 }
 0x14f   :  { %p709_p7 = por %p708_p6, %p707_p5 }
 0x151   :  { %p710_p8 = pnand %p709_p7, %p703_p4 }
 0x153   :  { %713 = shalt.err (!%p710_p8)
}
 0x154   :  { %s714_s15 = scalar_lea.hbm %s962_s4, 16 }
 0x155   :  { %p715_p9 = scmp.ne.s32.totalorder %s962_s4, %s714_s15  ;;  %p718_p10 = scmp.lt.u32.totalorder %s714_s15, %s962_s4 }
 0x157   :  { %p720_p11 = pnand %p718_p10, %p715_p9 }
 0x159   :  { %723 = shalt.err (!%p720_p11)
}
 0x15a   :  { %484 = dma.vmem_to_hbm [thread:$0]  %s925_s27, 16, %s962_s4, [#allocation9]  }
 0x15b   :  { %728 = dma.done.wait [#allocation4], 1024  }
 0x15c   :  { %729 = vsyncadd [#allocation4], 4294966272 }
 0x15d   :  { %730 = dma.done.wait [#allocation9], 32  }
 0x15e   :  { %731 = vsyncadd [#allocation9], 4294967264 }
 0x15f   :  { %494 = vsyncpa [#allocation3], 1 }
 0x160   :  { %495 = vsyncpa [#allocation6], 1 }
 0x161   :  { %496 = vsyncpa [#allocation4], 1 }
 0x162   :  { %497 = vsyncpa [#allocation9], 1 }

</bundles_post_ra>
